<compile_context>
chip_gen: v7x
topology: tpu7x:2x2x1
jax: 0.10.0
libtpu: 0.0.40
codegen_flags: <defaults>
</compile_context>

<pallas_src>
import functools

import jax
import jax.numpy as jnp
from jax import lax
from jax.experimental import pallas as pl
from jax.experimental.pallas import tpu as pltpu


# ---------------------------------------------------------------------------
# TPU-generation aware sizing helpers
# ---------------------------------------------------------------------------
def _tpu_generation():
    """Best-effort TPU generation from device_kind (None if unknown)."""
    try:
        kind = jax.devices()[0].device_kind.lower()
    except Exception:
        return None
    for g in (7, 6, 5, 4, 3):
        if (f"v{g}" in kind) or (f"tpu{g}" in kind):
            return g
    return None


def _vmem_budget_bytes(gen):
    if gen is None:
        return 32 << 20        # conservative: stay near the default scoped limit
    if gen >= 7:
        return 64 << 20        # v7x: 64 MiB physical VMEM per TensorCore
    return 128 << 20           # v5e / v6e: 128 MiB


def _pick_rows(n, cap=256):
    """Row tile: full batch if small, else largest multiple-of-8 divisor <= cap."""
    if n <= cap:
        return n
    best = None
    for t in range(8, cap + 1, 8):
        if n % t == 0:
            best = t
    return best if best is not None else n


def _pick_tn(outdim, cap):
    """Largest multiple of 128 dividing outdim that is <= cap (or full dim)."""
    if outdim <= cap:
        return outdim
    best = None
    t = 128
    while t <= cap:
        if outdim % t == 0:
            best = t
        t += 128
    return best if best is not None else outdim


def _pick_block_rows(n, cap=128):
    """Gumbel row tile: <=cap and >=2 grid steps when possible (megacore)."""
    if n <= 8:
        return n
    hi = min(cap, max(8, (n // 2) // 8 * 8))
    best = None
    for t in range(8, hi + 1, 8):
        if n % t == 0:
            best = t
    return best if best is not None else n


# ---------------------------------------------------------------------------
# Fused Linear + folded BatchNorm (+ optional ReLU), full-K weight tiles
# ---------------------------------------------------------------------------
def _linear_bn_kernel(x_ref, w_ref, t_ref, o_ref, *, relu):
    y = jnp.dot(x_ref[...], w_ref[...], preferred_element_type=jnp.float32)
    y = y + t_ref[...]
    if relu:
        y = jnp.maximum(y, 0.0)
    o_ref[...] = y.astype(o_ref.dtype)


def linear_bn(x, w, t, *, relu, out_dtype):
    """y = (x @ w) + t (optionally ReLU).  BN scale is pre-folded into w."""
    n, kdim = x.shape
    kdim2, outdim = w.shape
    assert kdim == kdim2

    gen = _tpu_generation()
    budget = _vmem_budget_bytes(gen)

    rows = _pick_rows(n, cap=256)
    # Full-K weight tiles; cap tn so the double-buffered bf16 weight stream
    # uses at most ~half the VMEM budget (e.g. K=8192 -> tn<=1024 on v7x,
    # tn<=2048 on v5e/v6e).
    tn_cap = (budget // 2) // (kdim * 4)           # 2 B/elem * 2 buffers
    tn_cap = max(128, min(2048, (tn_cap // 128) * 128))
    tn = _pick_tn(outdim, tn_cap)

    out_bytes = jnp.dtype(out_dtype).itemsize
    need = 2 * (rows * kdim * 2 + kdim * tn * 2 + tn * 4 + rows * tn * out_bytes)
    need += rows * tn * 4                          # f32 matmul intermediate
    cp_kwargs = dict(dimension_semantics=("parallel", "parallel"))
    if need > (16 << 20):                          # only raise when tiles need it
        cp_kwargs["vmem_limit_bytes"] = int(min(max(need * 5 // 4, 32 << 20),
                                                budget))

    grid = (n // rows, outdim // tn)
    return pl.pallas_call(
        functools.partial(_linear_bn_kernel, relu=relu),
        out_shape=jax.ShapeDtypeStruct((n, outdim), out_dtype),
        grid_spec=pltpu.PrefetchScalarGridSpec(
            num_scalar_prefetch=0,
            grid=grid,
            in_specs=[
                pl.BlockSpec((rows, kdim), lambda i, j: (i, 0)),  # activations
                pl.BlockSpec((kdim, tn), lambda i, j: (0, j)),    # W * bn_scale
                pl.BlockSpec((1, tn), lambda i, j: (0, j)),       # BN shift
            ],
            out_specs=pl.BlockSpec((rows, tn), lambda i, j: (i, j)),
        ),
        compiler_params=pltpu.CompilerParams(**cp_kwargs),
    )(x, w, t)


# ---------------------------------------------------------------------------
# k-round Gumbel-softmax + running max
# ---------------------------------------------------------------------------
def _mix32(x):
    """murmur3/splitmix-style 32-bit finalizer (uint32, wrapping arithmetic)."""
    x = (x ^ (x >> 16)) * jnp.uint32(0x7FEB352D)
    x = (x ^ (x >> 15)) * jnp.uint32(0x846CA68B)
    x = x ^ (x >> 16)
    return x


def _gumbel_max_kernel(seed_ref, mask_ref, z_ref, *,
                       k, tau, n_classes, block_rows, use_bf16_exp):
    mask0 = mask_ref[...].astype(jnp.float32)
    shape = mask0.shape

    # Per-element global counter, hashed once (heavy mix).  Global row index
    # keeps the stream independent of tiling and distinct across grid steps /
    # TensorCores.  All counter math is uint32 (no int32 overflow).
    row0 = pl.program_id(0) * block_rows
    rows_u = (lax.broadcasted_iota(jnp.int32, shape, 0) + row0).astype(jnp.uint32)
    cols_u = lax.broadcasted_iota(jnp.int32, shape, 1).astype(jnp.uint32)
    seed_u = seed_ref[0].astype(jnp.uint32)
    base = _mix32(rows_u * jnp.uint32(n_classes) + cols_u
                  + seed_u * jnp.uint32(0x85EBCA6B))

    inv_tau = jnp.float32(1.0 / tau)
    fast_half_tau = (tau == 0.5)
    mant_mask = jnp.uint32(0x007FFFFF)
    one_bits = jnp.uint32(0x3F800000)
    one_minus_eps = jnp.float32(1.0 - 2.0 ** -24)

    def _exp(a):
        if use_bf16_exp:                     # bf16 EUP path (v6e / v7x only)
            return jnp.exp(a.astype(jnp.bfloat16)).astype(jnp.float32)
        return jnp.exp(a)                    # v5e has no bf16 EUP

    def _uniform(rnd):
        # Light per-round remix (base is already well mixed): 1 mul + xorshift.
        r = (rnd + 1).astype(jnp.uint32) * jnp.uint32(0x9E3779B9)
        x = base ^ r
        x = (x ^ (x >> 15)) * jnp.uint32(0x2C1B3C6D)
        x = x ^ (x >> 13)
        # Mantissa bit-trick: float in [1,2) minus (1 - 2^-24) -> U in
        # [2^-24, 1 - 2^-24]; no int->float convert, logs stay finite.
        f = pltpu.bitcast((x & mant_mask) | one_bits, jnp.float32)
        return f - one_minus_eps

    def one_round(rnd, mask, z):
        lu = -jnp.log(_uniform(rnd))                     # Exp(1) = -log U (f32)
        if fast_half_tau:
            # softmax((mask + g)/tau), g = -log(lu), tau = 1/2:
            #   exp(g/tau) = lu^-2  -> drop one log/elem/round; max over mask only.
            m = jnp.max(mask, axis=-1, keepdims=True)
            e = _exp((mask - m) * inv_tau) * pl.reciprocal(lu * lu, approx=True)
        else:
            logits = (mask - jnp.log(lu)) * inv_tau
            m = jnp.max(logits, axis=-1, keepdims=True)
            e = _exp(logits - m)
        inv = pl.reciprocal(jnp.sum(e, axis=-1, keepdims=True), approx=True)
        y = e * inv
        return y, jnp.maximum(y, z)

    # Manual x4 unroll: lets the scheduler interleave EUP / XLU / VALU work.
    unroll = 4 if k % 4 == 0 else (2 if k % 2 == 0 else 1)

    def body(it, carry):
        mask, z = carry
        for j in range(unroll):
            mask, z = one_round(it * unroll + j, mask, z)
        return mask, z

    _, z = lax.fori_loop(0, k // unroll, body, (mask0, jnp.zeros_like(mask0)))
    z_ref[...] = z


def gumbel_max(mask0, *, seed, k, tau):
    n, c = mask0.shape
    block_rows = _pick_block_rows(n)
    gen = _tpu_generation()
    use_bf16_exp = (gen is not None) and (gen >= 6)
    kernel = functools.partial(_gumbel_max_kernel, k=k, tau=tau, n_classes=c,
                               block_rows=block_rows, use_bf16_exp=use_bf16_exp)
    return pl.pallas_call(
        kernel,
        out_shape=jax.ShapeDtypeStruct((n, c), jnp.float32),
        grid_spec=pltpu.PrefetchScalarGridSpec(
            num_scalar_prefetch=1,
            grid=(n // block_rows,),
            in_specs=[pl.BlockSpec((block_rows, c),
                                   lambda i, seed_ref: (i, 0))],
            out_specs=pl.BlockSpec((block_rows, c),
                                   lambda i, seed_ref: (i, 0)),
        ),
        compiler_params=pltpu.CompilerParams(
            dimension_semantics=("parallel",)),
    )(jnp.asarray([seed], jnp.int32), mask0)


# ---------------------------------------------------------------------------
# Parameters (eval-mode BatchNorm folded: scale into bf16 weights, shift kept)
# ---------------------------------------------------------------------------
def init_params(key, in_dim, middle, num_classes, eps=1e-5):
    ks = jax.random.split(key, 18)

    def linear(kw, kb, fan_in, fan_out):
        bound = 1.0 / float(fan_in) ** 0.5
        w = jax.random.uniform(kw, (fan_in, fan_out), jnp.float32, -bound, bound)
        b = jax.random.uniform(kb, (fan_out,), jnp.float32, -bound, bound)
        return w, b

    def bn_stats(kg, kb, km, kv, dim, affine):
        gamma = (jax.random.uniform(kg, (dim,), jnp.float32, 0.5, 1.5)
                 if affine else jnp.ones((dim,), jnp.float32))
        beta = (jax.random.uniform(kb, (dim,), jnp.float32, -0.5, 0.5)
                if affine else jnp.zeros((dim,), jnp.float32))
        mean = jax.random.uniform(km, (dim,), jnp.float32, -0.5, 0.5)
        var = jax.random.uniform(kv, (dim,), jnp.float32, 0.5, 1.5)
        return gamma, beta, mean, var

    w1, b1 = linear(ks[0], ks[1], in_dim, middle)
    w2, b2 = linear(ks[2], ks[3], middle, middle)
    w3, b3 = linear(ks[4], ks[5], middle, num_classes)

    g1, be1, m1, v1 = bn_stats(ks[6], ks[7], ks[8], ks[9], middle, True)
    g2, be2, m2, v2 = bn_stats(ks[10], ks[11], ks[12], ks[13], middle, True)
    g3, be3, m3, v3 = bn_stats(ks[14], ks[15], ks[16], ks[17], num_classes, False)

    # y = (x @ (W*s)) + t,  s = gamma/sqrt(var+eps),  t = (b - mean)*s + beta
    def fold(w, b, gamma, beta, mean, var):
        s = gamma * lax.rsqrt(var + eps)
        w_eff = (w * s[None, :]).astype(jnp.bfloat16)   # bf16 weight streaming
        t = ((b - mean) * s + beta).reshape(1, -1)      # f32 shift
        return w_eff, t

    w1, t1 = fold(w1, b1, g1, be1, m1, v1)
    w2, t2 = fold(w2, b2, g2, be2, m2, v2)
    w3, t3 = fold(w3, b3, g3, be3, m3, v3)
    return dict(w1=w1, t1=t1, w2=w2, t2=t2, w3=w3, t3=t3)


# ---------------------------------------------------------------------------
# Full forward
# ---------------------------------------------------------------------------
def masker_logits(f, params):
    x = f.astype(jnp.bfloat16)
    h1 = linear_bn(x, params["w1"], params["t1"], relu=True, out_dtype=jnp.bfloat16)
    h2 = linear_bn(h1, params["w2"], params["t2"], relu=True, out_dtype=jnp.bfloat16)
    return linear_bn(h2, params["w3"], params["t3"], relu=False,
                     out_dtype=jnp.float32)


def masker_forward(f, params, *, seed, k, tau=0.5):
    return gumbel_max(masker_logits(f, params), seed=seed, k=k, tau=tau)


def _mlp_reference(f, params):
    """Pure-JAX reference for the deterministic MLP part (same dtype flow)."""
    def layer(x, w, t, relu, out_dtype):
        y = jnp.dot(x.astype(jnp.float32), w.astype(jnp.float32),
                    preferred_element_type=jnp.float32) + t
        if relu:
            y = jnp.maximum(y, 0.0)
        return y.astype(out_dtype)
    x = f.astype(jnp.bfloat16)
    h1 = layer(x, params["w1"], params["t1"], True, jnp.bfloat16)
    h2 = layer(h1, params["w2"], params["t2"], True, jnp.bfloat16)
    return layer(h2, params["w3"], params["t3"], False, jnp.float32)


if __name__ == "__main__":
    # Small, TPU-tile-aligned shapes consistent with the module's forward
    # (the real module uses in_dim=2048, middle=8192, num_classes=2048, k=1024).
    N, IN_DIM, MIDDLE, NUM_CLASSES, K = 8, 256, 512, 256, 8

    root = jax.random.PRNGKey(0)
    kx, kp = jax.random.split(root)
    f = jax.random.normal(kx, (N, IN_DIM), jnp.float32)
    params = init_params(kp, IN_DIM, MIDDLE, NUM_CLASSES)

    # Deterministic MLP part checked against a pure-JAX reference.
    mask0 = jax.block_until_ready(masker_logits(f, params))
    ref = _mlp_reference(f, params)
    assert mask0.shape == (N, NUM_CLASSES)
    assert bool(jnp.allclose(mask0, ref, rtol=2e-2, atol=2e-2)), (
        "mask0 mismatch, max abs err = %e" % float(jnp.max(jnp.abs(mask0 - ref))))

    # Stochastic gumbel/running-max part: structural checks.
    z = jax.block_until_ready(gumbel_max(mask0, seed=1234, k=K, tau=0.5))
    assert z.shape == (N, NUM_CLASSES), z.shape
    assert z.dtype == jnp.float32
    assert bool(jnp.all(jnp.isfinite(z)))
    # Running max of softmax rows -> values in [0, 1] (tiny slack for approx vrcp).
    assert bool(jnp.all((z >= 0.0) & (z <= 1.0 + 1e-3)))
    # Each row's max softmax prob is >= 1/num_classes.
    assert bool(jnp.all(jnp.max(z, axis=1) >= 0.5 / NUM_CLASSES))
    print("KERNEL_OK")
</pallas_src>

<mosaic_0001>
module attributes {stable_mosaic.version = 11 : i64} {
  func.func @_linear_bn_kernel(%arg0: i32, %arg1: i32, %arg2: memref<8x256xbf16, #tpu.memory_space<vmem>>, %arg3: memref<256x512xbf16, #tpu.memory_space<vmem>>, %arg4: memref<1x512xf32, #tpu.memory_space<vmem>>, %arg5: memref<8x512xbf16, #tpu.memory_space<vmem>>) attributes {dimension_semantics = [#tpu.dimension_semantics<parallel>, #tpu.dimension_semantics<parallel>], iteration_bounds = array<i64: 1, 1>, scalar_prefetch = 0 : i64, scratch_operands = 0 : i64, tpu.core_type = #tpu.core_type<tc>, window_params = [{transform_indices = @transform_0, window_bounds = array<i64: 8, 256>}, {transform_indices = @transform_1, window_bounds = array<i64: 256, 512>}, {transform_indices = @transform_2, window_bounds = array<i64: 1, 512>}, {transform_indices = @transform_3, window_bounds = array<i64: 8, 512>}]} {
    %c0 = arith.constant 0 : index
    %c0_0 = arith.constant 0 : index
    %0 = vector.load %arg2[%c0, %c0_0] : memref<8x256xbf16, #tpu.memory_space<vmem>>, vector<8x256xbf16>
    %c0_1 = arith.constant 0 : index
    %c0_2 = arith.constant 0 : index
    %1 = vector.load %arg3[%c0_1, %c0_2] : memref<256x512xbf16, #tpu.memory_space<vmem>>, vector<256x512xbf16>
    %cst = arith.constant dense<0.000000e+00> : vector<8x512xf32>
    %2 = tpu.matmul %0, %1, %cst {dimension_numbers = #tpu.dot_dimension_numbers<[1], [0], [0], [1], [0, 0, 1, 1], [], []>} : vector<8x256xbf16>, vector<256x512xbf16>, vector<8x512xf32> -> vector<8x512xf32>
    %c0_3 = arith.constant 0 : index
    %c0_4 = arith.constant 0 : index
    %3 = vector.load %arg4[%c0_3, %c0_4] : memref<1x512xf32, #tpu.memory_space<vmem>>, vector<1x512xf32>
    %4 = vector.broadcast %3 : vector<1x512xf32> to vector<8x512xf32>
    %5 = arith.addf %2, %4 : vector<8x512xf32>
    %cst_5 = arith.constant 0.000000e+00 : f32
    %6 = vector.broadcast %cst_5 : f32 to vector<8x512xf32>
    %7 = arith.maximumf %5, %6 : vector<8x512xf32>
    %8 = arith.truncf %7 : vector<8x512xf32> to vector<8x512xbf16>
    %c0_6 = arith.constant 0 : index
    %c0_7 = arith.constant 0 : index
    %9 = vector.load %arg5[%c0_6, %c0_7] : memref<8x512xbf16, #tpu.memory_space<vmem>>, vector<8x512xbf16>
    tpu.vector_store %arg5[%c0_6, %c0_7], %8 {strides = array<i32>} : memref<8x512xbf16, #tpu.memory_space<vmem>>, vector<8x512xbf16>,
    return
  }
  func.func @transform_0(%arg0: i32, %arg1: i32) -> (i32, i32) {
    %c0_i32 = arith.constant 0 : i32
    %c0_i32_0 = arith.constant 0 : i32
    return %arg0, %c0_i32 : i32, i32
  }
  func.func @transform_1(%arg0: i32, %arg1: i32) -> (i32, i32) {
    %c0_i32 = arith.constant 0 : i32
    %c0_i32_0 = arith.constant 0 : i32
    return %c0_i32, %arg1 : i32, i32
  }
  func.func @transform_2(%arg0: i32, %arg1: i32) -> (i32, i32) {
    %c0_i32 = arith.constant 0 : i32
    %c0_i32_0 = arith.constant 0 : i32
    return %c0_i32, %arg1 : i32, i32
  }
  func.func @transform_3(%arg0: i32, %arg1: i32) -> (i32, i32) {
    %c0_i32 = arith.constant 0 : i32
    return %arg0, %arg1 : i32, i32
  }
}

</mosaic_0001>

<bundles_post_ra>
// kernel: tpu_custom_call.1
= control target key start
LH: loop header
LB: loop body
LE: loop exit
PB: predicated region body
PF: predicated region fallthrough
CT: control target
= control target key end

     0   :  { %8 = vsyncpa [#allocation3], 0  ;;  %s891_s0 = inlined_call_operand.hbm [shape: bf16[8,256], index: 0, kind: input, shape index: {}]   ;;  %s892_s1 = inlined_call_operand.hbm [shape: bf16[256,512], index: 1, kind: input, shape index: {}]   ;;  %s893_s2 = inlined_call_operand.vmem [shape: f32[1,512], index: 2, kind: input, shape index: {}]   ;;  %s894_s3 = inlined_call_operand.hbm [shape: bf16[8,512], index: 3, kind: output, shape index: {}]  }
   0x1   :  { %9 = vsyncpa [#allocation6], 0 }
   0x2   :  { %10 = vsyncpa [#allocation4], 0  ;;  %s820_s12 = smov [#allocation2]   ;;  %s821_s14 = smov [#allocation5]  }
   0x3   :  { %s17_s13 = sshll.u32 %s820_s12, 4  ;;  %s26_s15 = sshll.u32 %s821_s14, 4  ;;  %s18_s13 = int_to_ptr.vmem [resolvable:$true] %s17_s13  ;;  %s845_s15 = int_to_ptr.vmem [resolvable:$true] %s26_s15 }
   0x4   :  { %s748_s18 = scalar_lea.hbm %s891_s0, 128 }
   0x5   :  { %p749_p0 = scmp.ne.s32.totalorder %s891_s0, %s748_s18  ;;  %p752_p1 = scmp.lt.u32.totalorder %s748_s18, %s891_s0 }
   0x7   :  { %p754_p2 = pnand %p752_p1, %p749_p0 }
   0x9   :  { %757 = shalt.err (!%p754_p2)
}
   0xa   :  { %s758_s23 = scalar_lea.vmem %s18_s13, 128  ;;  %p763_p4 = scmp.lt.s32.totalorder %s18_s13, %s18_s13 }
   0xb   :  { %p759_p3 = scmp.ne.s32.totalorder %s18_s13, %s758_s23  ;;  %p764_p5 = scmp.lt.s32.totalorder %s758_s23, %s758_s23 }
   0xd   :  { %p765_p6 = por %p764_p5, %p763_p4 }
   0xf   :  { %p766_p7 = pnand %p765_p6, %p759_p3 }
  0x11   :  { %769 = shalt.err (!%p766_p7)
}
  0x12   :  { %20 = dma.hbm_to_vmem [thread:$0]  %s891_s0, 128, %s18_s13, [#allocation3]  }
  0x13   :  { %s770_s28 = scalar_lea.hbm %s892_s1, 8192 }
  0x14   :  { %p771_p8 = scmp.ne.s32.totalorder %s892_s1, %s770_s28  ;;  %p774_p9 = scmp.lt.u32.totalorder %s770_s28, %s892_s1 }
  0x16   :  { %p776_p10 = pnand %p774_p9, %p771_p8 }
  0x18   :  { %779 = shalt.err (!%p776_p10)
}
  0x19   :  { %s780_s6 = scalar_lea.vmem %s845_s15, 8192  ;;  %p785_p12 = scmp.lt.s32.totalorder %s845_s15, %s845_s15 }
  0x1a   :  { %p781_p11 = scmp.ne.s32.totalorder %s845_s15, %s780_s6  ;;  %p786_p13 = scmp.lt.s32.totalorder %s780_s6, %s780_s6 }
  0x1c   :  { %p787_p0 = por %p786_p13, %p785_p12 }
  0x1e   :  { %p788_p1 = pnand %p787_p0, %p781_p11 }
  0x20   :  { %791 = shalt.err (!%p788_p1)
}
  0x21   :  { %s822_s0 = smov 256   ;;  %s823_s7 = smov 16  }
  0x22   :  { %32 = dma.hbm_to_vmem [thread:$0]  %s892_s1, 8192, %s845_s15, [#allocation6], %s822_s0, %s822_s0, %s823_s7  }
  0x23   :  { %814 = dma.done.wait [#allocation3], 128  }
  0x24   :  { %815 = vsyncadd [#allocation3], 4294967168 }
  0x25   :  { %816 = dma.done.wait [#allocation6], 8192  }
  0x26   :  { %817 = vsyncadd [#allocation6], 4294959104  ;;  %v650_v0 = vld [vmem:[#allocation5 + $0x4] ss:$16 sps:$4 sm:$0xff]   ;;  %v652_v1 = vld [vmem:[#allocation5 + $0xc] ss:$16 sps:$4 sm:$0xff]  }
  0x27   :  { %455 = vmatprep.subr.bf16.mxu0 %v650_v0  ;;  %v654_v2 = vld [vmem:[#allocation5] ss:$16 sps:$4 sm:$0xff]   ;;  %v655_v3 = vld [vmem:[#allocation5 + $0x8] ss:$16 sps:$4 sm:$0xff]   ;;  %496 = vmatprep.subr.bf16.mxu1 %v652_v1  ;;  %v656_v4 = vld [vmem:[#allocation5 + $0x24] ss:$16 sps:$4 sm:$0xff]  }
  0x28   :  { %456 = vmatpush1.bf16.msra.mxu0 %v654_v2  ;;  %497 = vmatpush1.bf16.msra.mxu1 %v655_v3  ;;  %v658_v5 = vld [vmem:[#allocation5 + $0x2c] ss:$16 sps:$4 sm:$0xff]   ;;  %v660_v6 = vld [vmem:[#allocation5 + $0x20] ss:$16 sps:$4 sm:$0xff]   ;;  %v661_v7 = vld [vmem:[#allocation5 + $0x28] ss:$16 sps:$4 sm:$0xff]   ;;  %v108_v3 = vlaneseq }
  0x29   :  { %457 = vmatprep.subr.bf16.mxu0 %v656_v4  ;;  %498 = vmatprep.subr.bf16.mxu1 %v658_v5  ;;  %v662_v8 = vld [vmem:[#allocation5 + $0x44] ss:$16 sps:$4 sm:$0xff]   ;;  %v664_v9 = vld [vmem:[#allocation5 + $0x4c] ss:$16 sps:$4 sm:$0xff]   ;;  %v666_v10 = vld [vmem:[#allocation5 + $0x40] ss:$16 sps:$4 sm:$0xff]  }
  0x2a   :  { %v667_v11 = vld [vmem:[#allocation5 + $0x48] ss:$16 sps:$4 sm:$0xff]   ;;  %v668_v12 = vld [vmem:[#allocation5 + $0x64] ss:$16 sps:$4 sm:$0xff]   ;;  %v670_v13 = vld [vmem:[#allocation5 + $0x6c] ss:$16 sps:$4 sm:$0xff]  }
  0x2b   :  { %v672_v14 = vld [vmem:[#allocation5 + $0x60] ss:$16 sps:$4 sm:$0xff]   ;;  %v673_v15 = vld [vmem:[#allocation5 + $0x68] ss:$16 sps:$4 sm:$0xff]   ;;  %v674_v16 = vld [vmem:[#allocation5 + $0x84] ss:$16 sps:$4 sm:$0xff]  }
  0x2c   :  { %458 = vmatpush1.bf16.msra.mxu0 %v660_v6  ;;  %499 = vmatpush1.bf16.msra.mxu1 %v661_v7  ;;  %v676_v17 = vld [vmem:[#allocation5 + $0x8c] ss:$16 sps:$4 sm:$0xff]   ;;  %v678_v18 = vld [vmem:[#allocation5 + $0x80] ss:$16 sps:$4 sm:$0xff]   ;;  %v679_v19 = vld [vmem:[#allocation5 + $0x88] ss:$16 sps:$4 sm:$0xff]  }
  0x2d   :  { %459 = vmatprep.subr.bf16.mxu0 %v662_v8  ;;  %500 = vmatprep.subr.bf16.mxu1 %v664_v9  ;;  %v680_v20 = vld [vmem:[#allocation5 + $0xa4] ss:$16 sps:$4 sm:$0xff]   ;;  %v682_v21 = vld [vmem:[#allocation5 + $0xac] ss:$16 sps:$4 sm:$0xff]   ;;  %v684_v22 = vld [vmem:[#allocation5 + $0xa0] ss:$16 sps:$4 sm:$0xff]  }
  0x2e   :  { %v685_v23 = vld [vmem:[#allocation5 + $0xa8] ss:$16 sps:$4 sm:$0xff]   ;;  %v686_v24 = vld [vmem:[#allocation5 + $0xc4] ss:$16 sps:$4 sm:$0xff]   ;;  %v688_v25 = vld [vmem:[#allocation5 + $0xcc] ss:$16 sps:$4 sm:$0xff]  }
  0x2f   :  { %v690_v26 = vld [vmem:[#allocation5 + $0xc0] ss:$16 sps:$4 sm:$0xff]   ;;  %v691_v27 = vld [vmem:[#allocation5 + $0xc8] ss:$16 sps:$4 sm:$0xff]   ;;  %v692_v28 = vld [vmem:[#allocation5 + $0xe4] ss:$16 sps:$4 sm:$0xff]  }
  0x30   :  { %460 = vmatpush1.bf16.msra.mxu0 %v666_v10  ;;  %501 = vmatpush1.bf16.msra.mxu1 %v667_v11  ;;  %v694_v29 = vld [vmem:[#allocation5 + $0xec] ss:$16 sps:$4 sm:$0xff]   ;;  %v696_v30 = vld [vmem:[#allocation5 + $0xe0] ss:$16 sps:$4 sm:$0xff]   ;;  %v697_v31 = vld [vmem:[#allocation5 + $0xe8] ss:$16 sps:$4 sm:$0xff]  }
  0x31   :  { %461 = vmatprep.subr.bf16.mxu0 %v668_v12  ;;  %502 = vmatprep.subr.bf16.mxu1 %v670_v13  ;;  %v698_v32 = vld [vmem:[#allocation5 + $0x104] ss:$16 sps:$4 sm:$0xff]   ;;  %v700_v33 = vld [vmem:[#allocation5 + $0x10c] ss:$16 sps:$4 sm:$0xff]   ;;  %v702_v34 = vld [vmem:[#allocation5 + $0x100] ss:$16 sps:$4 sm:$0xff]  }
  0x32   :  { %v703_v35 = vld [vmem:[#allocation5 + $0x108] ss:$16 sps:$4 sm:$0xff]   ;;  %v704_v36 = vld [vmem:[#allocation5 + $0x124] ss:$16 sps:$4 sm:$0xff]   ;;  %v706_v37 = vld [vmem:[#allocation5 + $0x12c] ss:$16 sps:$4 sm:$0xff]  }
  0x33   :  { %v708_v38 = vld [vmem:[#allocation5 + $0x120] ss:$16 sps:$4 sm:$0xff]   ;;  %v709_v39 = vld [vmem:[#allocation5 + $0x128] ss:$16 sps:$4 sm:$0xff]   ;;  %v710_v40 = vld [vmem:[#allocation5 + $0x144] ss:$16 sps:$4 sm:$0xff]  }
  0x34   :  { %462 = vmatpush1.bf16.msra.mxu0 %v672_v14  ;;  %503 = vmatpush1.bf16.msra.mxu1 %v673_v15  ;;  %v712_v41 = vld [vmem:[#allocation5 + $0x14c] ss:$16 sps:$4 sm:$0xff]   ;;  %v714_v42 = vld [vmem:[#allocation5 + $0x140] ss:$16 sps:$4 sm:$0xff]   ;;  %v715_v43 = vld [vmem:[#allocation5 + $0x148] ss:$16 sps:$4 sm:$0xff]  }
  0x35   :  { %463 = vmatprep.subr.bf16.mxu0 %v674_v16  ;;  %504 = vmatprep.subr.bf16.mxu1 %v676_v17  ;;  %v716_v44 = vld [vmem:[#allocation5 + $0x164] ss:$16 sps:$4 sm:$0xff]   ;;  %v718_v45 = vld [vmem:[#allocation5 + $0x16c] ss:$16 sps:$4 sm:$0xff]   ;;  %v720_v48 = vld [vmem:[#allocation5 + $0x160] ss:$16 sps:$4 sm:$0xff]  }
  0x36   :  { %v41_v46 = vld [vmem:[#allocation2] sm:$0xff]  ;;  %v722_v50 = vld [vmem:[#allocation5 + $0x184] ss:$16 sps:$4 sm:$0xff]   ;;  %v726_v52 = vld [vmem:[#allocation5 + $0x180] ss:$16 sps:$4 sm:$0xff]   ;;  %v109_v4 = vshrl.u32 %v108_v3, 7 }
  0x37   :  { %v576_v47 = vcombine.high %v41_v46, %v41_v46  ;;  %v721_v49 = vld [vmem:[#allocation5 + $0x168] ss:$16 sps:$4 sm:$0xff]   ;;  %v724_v51 = vld [vmem:[#allocation5 + $0x18c] ss:$16 sps:$4 sm:$0xff]   ;;  %v728_v54 = vld [vmem:[#allocation5 + $0x1a4] ss:$16 sps:$4 sm:$0xff]   ;;  %v575_v2 = vcombine.low %v41_v46, %v41_v46 }
  0x38   :  { %464 = vmatpush1.bf16.msra.mxu0 %v678_v18  ;;  %505 = vmatpush1.bf16.msra.mxu1 %v679_v19  ;;  %v727_v53 = vld [vmem:[#allocation5 + $0x188] ss:$16 sps:$4 sm:$0xff]   ;;  %v730_v55 = vld [vmem:[#allocation5 + $0x1ac] ss:$16 sps:$4 sm:$0xff]   ;;  %v732_v56 = vld [vmem:[#allocation5 + $0x1a0] ss:$16 sps:$4 sm:$0xff]  }
  0x39   :  { %465 = vmatprep.subr.bf16.mxu0 %v680_v20  ;;  %506 = vmatprep.subr.bf16.mxu1 %v682_v21  ;;  %v733_v57 = vld [vmem:[#allocation5 + $0x1a8] ss:$16 sps:$4 sm:$0xff]   ;;  %v734_v58 = vld [vmem:[#allocation5 + $0x1c4] ss:$16 sps:$4 sm:$0xff]   ;;  %v736_v59 = vld [vmem:[#allocation5 + $0x1cc] ss:$16 sps:$4 sm:$0xff]  }
  0x3a   :  { %487 = vmatprep.mubr.bf16.mxu0 %v576_v47  ;;  %528 = vmatprep.mubr.bf16.mxu1 %v576_v47  ;;  %v738_v60 = vld [vmem:[#allocation5 + $0x1c0] ss:$16 sps:$4 sm:$0xff]   ;;  %v739_v61 = vld [vmem:[#allocation5 + $0x1c8] ss:$16 sps:$4 sm:$0xff]   ;;  %v740_v62 = vld [vmem:[#allocation5 + $0x1e4] ss:$16 sps:$4 sm:$0xff]  }
  0x3b   :  { %v742_v63 = vld [vmem:[#allocation5 + $0x1ec] ss:$16 sps:$4 sm:$0xff]   ;;  %v744_v0 = vld [vmem:[#allocation5 + $0x1e0] ss:$16 sps:$4 sm:$0xff]   ;;  %v745_v1 = vld [vmem:[#allocation5 + $0x1e8] ss:$16 sps:$4 sm:$0xff]  }
  0x3c   :  { %466 = vmatpush1.bf16.msra.mxu0 %v684_v22  ;;  %507 = vmatpush1.bf16.msra.mxu1 %v685_v23  ;;  %v110_v5 = vsub.s32 0, %v109_v4  ;;  %v118_v6 = vsub.s32 2, %v109_v4  ;;  %v106_v7 = vld [vmem:[%s893_s2] sm:$0xf]  ;;  %v114_v8 = vsub.s32 1, %v109_v4  ;;  %v122_v9 = vsub.s32 3, %v109_v4 }
  0x3d   :  { %467 = vmatprep.subr.bf16.mxu0 %v686_v24  ;;  %508 = vmatprep.subr.bf16.mxu1 %v688_v25  ;;  %s824_s2 = smov [#allocation7]  }
  0x3e   :  { %v111_v10 = vrot.slane %v106_v7, %v110_v5  ;;  %v119_v11 = vrot.slane %v106_v7, %v118_v6  ;;  %v115_v12 = vrot.slane %v106_v7, %v114_v8  ;;  %v123_v13 = vrot.slane %v106_v7, %v122_v9  ;;  %s565_s11 = sshll.u32 %s824_s2, 4  ;;  %s566_s11 = int_to_ptr.vmem [resolvable:$true] %s565_s11 }
  0x3f   :  { %s792_s12 = scalar_lea.vmem %s566_s11, 256  ;;  %p797_p3 = scmp.lt.s32.totalorder %s566_s11, %s566_s11 }
  0x40   :  { %468 = vmatpush1.bf16.msra.mxu0 %v690_v26  ;;  %509 = vmatpush1.bf16.msra.mxu1 %v691_v27  ;;  %p793_p2 = scmp.ne.s32.totalorder %s566_s11, %s792_s12  ;;  %p798_p4 = scmp.lt.s32.totalorder %s792_s12, %s792_s12 }
  0x41   :  { %469 = vmatprep.subr.bf16.mxu0 %v692_v28  ;;  %510 = vmatprep.subr.bf16.mxu1 %v694_v29 }
  0x42   :  { %p799_p5 = por %p798_p4, %p797_p3 }
  0x44   :  { %470 = vmatpush1.bf16.msra.mxu0 %v696_v30  ;;  %511 = vmatpush1.bf16.msra.mxu1 %v697_v31  ;;  %p800_p6 = pnand %p799_p5, %p793_p2 }
  0x45   :  { %471 = vmatprep.subr.bf16.mxu0 %v698_v32  ;;  %512 = vmatprep.subr.bf16.mxu1 %v700_v33 }
  0x48   :  { %472 = vmatpush1.bf16.msra.mxu0 %v702_v34  ;;  %513 = vmatpush1.bf16.msra.mxu1 %v703_v35 }
  0x49   :  { %473 = vmatprep.subr.bf16.mxu0 %v704_v36  ;;  %514 = vmatprep.subr.bf16.mxu1 %v706_v37 }
  0x4c   :  { %474 = vmatpush1.bf16.msra.mxu0 %v708_v38  ;;  %515 = vmatpush1.bf16.msra.mxu1 %v709_v39 }
  0x4d   :  { %475 = vmatprep.subr.bf16.mxu0 %v710_v40  ;;  %516 = vmatprep.subr.bf16.mxu1 %v712_v41 }
  0x50   :  { %476 = vmatpush1.bf16.msra.mxu0 %v714_v42  ;;  %517 = vmatpush1.bf16.msra.mxu1 %v715_v43 }
  0x51   :  { %477 = vmatprep.subr.bf16.mxu0 %v716_v44  ;;  %518 = vmatprep.subr.bf16.mxu1 %v718_v45 }
  0x54   :  { %478 = vmatpush1.bf16.msra.mxu0 %v720_v48  ;;  %519 = vmatpush1.bf16.msra.mxu1 %v721_v49 }
  0x55   :  { %479 = vmatprep.subr.bf16.mxu0 %v722_v50  ;;  %520 = vmatprep.subr.bf16.mxu1 %v724_v51 }
  0x58   :  { %480 = vmatpush1.bf16.msra.mxu0 %v726_v52  ;;  %521 = vmatpush1.bf16.msra.mxu1 %v727_v53 }
  0x59   :  { %481 = vmatprep.subr.bf16.mxu0 %v728_v54  ;;  %522 = vmatprep.subr.bf16.mxu1 %v730_v55 }
  0x5c   :  { %482 = vmatpush1.bf16.msra.mxu0 %v732_v56  ;;  %523 = vmatpush1.bf16.msra.mxu1 %v733_v57 }
  0x5d   :  { %483 = vmatprep.subr.bf16.mxu0 %v734_v58  ;;  %524 = vmatprep.subr.bf16.mxu1 %v736_v59 }
  0x60   :  { %484 = vmatpush1.bf16.msra.mxu0 %v738_v60  ;;  %525 = vmatpush1.bf16.msra.mxu1 %v739_v61 }
  0x61   :  { %485 = vmatprep.subr.bf16.mxu0 %v740_v62  ;;  %526 = vmatprep.subr.bf16.mxu1 %v742_v63 }
  0x64   :  { %486 = vmatpush1.bf16.msra.mxu0 %v744_v0  ;;  %527 = vmatpush1.bf16.msra.mxu1 %v745_v1 }
  0x67   :  { %488 = vmatmul.mubr.bf16.vlgmr.msra.gmra.mrb[0].mxu0 %v575_v2  ;;  %529 = vmatmul.mubr.bf16.vlgmr.msra.gmra.mrb[0].mxu1 %v575_v2 }
 0x13a   :  { %v489_v14 = vpop.f32.mrb[0].mxu0  ;;  %v530_v15 = vpop.f32.mrb[0].mxu1 }
 0x13b   :  { %v490_v16 = vadd.f32 %v489_v14, %v111_v10  ;;  %v531_v17 = vadd.f32 %v530_v15, %v119_v11  ;;  %v491_v18 = vpop.f32.mrb[1].mxu0  ;;  %v532_v19 = vpop.f32.mrb[1].mxu1 }
 0x13c   :  { %v492_v20 = vadd.f32 %v491_v18, %v115_v12  ;;  %v533_v21 = vadd.f32 %v532_v19, %v123_v13  ;;  %v493_v22 = vpop.f32.mrb[2].mxu0  ;;  %v534_v23 = vpop.f32.mrb[2].mxu1 }
 0x13d   :  { %v537_v24 = vmax.f32 %v490_v16, 0.0  ;;  %v539_v25 = vmax.f32 %v531_v17, 0.0  ;;  %v494_v26 = vpop.f32.mrb[3].mxu0  ;;  %v535_v27 = vpop.f32.mrb[3].mxu1 }
 0x13e   :  { %v538_v28 = vmax.f32 %v492_v20, 0.0  ;;  %v540_v29 = vmax.f32 %v533_v21, 0.0 }
 0x140   :  { %v643_v30 = vpack.c.bf16 %v538_v28, %v537_v24  ;;  %v644_v31 = vpack.c.bf16 %v540_v29, %v539_v25 }
 0x142   :  { %557 = vst [vmem:[#allocation7] sm:$0xff] %v643_v30  ;;  %558 = vst [vmem:[#allocation7 + $0x8] sm:$0xff] %v644_v31 }
 0x143   :  { %803 = shalt.err (!%p800_p6)
}
 0x144   :  { %s804_s15 = scalar_lea.hbm %s894_s3, 256 }
 0x145   :  { %p805_p7 = scmp.ne.s32.totalorder %s894_s3, %s804_s15  ;;  %p808_p8 = scmp.lt.u32.totalorder %s804_s15, %s894_s3 }
 0x147   :  { %p810_p9 = pnand %p808_p8, %p805_p7 }
 0x149   :  { %813 = shalt.err (!%p810_p9)
}
 0x14a   :  { %568 = dma.vmem_to_hbm [thread:$0]  %s566_s11, 256, %s894_s3, [#allocation4]  }
 0x14b   :  { %818 = dma.done.wait [#allocation4], 256  }
 0x14c   :  { %819 = vsyncadd [#allocation4], 4294967040 }
 0x14d   :  { %572 = vsyncpa [#allocation3], 1 }
 0x14e   :  { %573 = vsyncpa [#allocation6], 1 }
 0x14f   :  { %574 = vsyncpa [#allocation4], 1 }

</bundles_post_ra>
